<compile_context>
chip_gen: v6e
topology: v6e:2x2x1
jax: 0.10.0
libtpu: 0.0.40
codegen_flags: <defaults>
</compile_context>

<pallas_src>
import functools

import jax
import jax.numpy as jnp
import numpy as np
from jax import lax
from jax.experimental import pallas as pl
from jax.experimental.pallas import tpu as pltpu


def _round_up(x, m):
    return (x + m - 1) // m * m


# -----------------------------------------------------------------------------
# Kernel body: three matmuls + bias / ReLU / max on lane-dense tiles.
# -----------------------------------------------------------------------------
def _cnn_encoder_kernel(x_ref, w1b_ref, b1_ref, w2b_ref, b2_ref, wfc_ref,
                        bfc_ref, o_ref):
    # x_ref  : (BT, L)            bf16
    # w1b_ref: (L, 2*L2*C1)       bf16, conv1 banded weight, [even | odd] halves
    # b1_ref : (1, 2*L2*C1)       f32
    # w2b_ref: (L2*C1, L2*C2)     bf16, conv2 banded weight (im2col folded in)
    # b2_ref : (1, L2*C2)         f32
    # wfc_ref: (L2*C2, OUT_PAD)   bf16, fc weight (flatten permutation folded in)
    # bfc_ref: (1, OUT_PAD)       f32
    # o_ref  : (BT, OUT_PAD)      f32
    H = w1b_ref.shape[1] // 2                                    # L2 * C1

    # ---- Conv1d(1->C1, k=3, p=1) + bias + ReLU + MaxPool1d(2, 2) -----------
    y1 = jnp.dot(x_ref[...], w1b_ref[...],
                 preferred_element_type=jnp.float32) + b1_ref[...]
    # max(relu(even), relu(odd)) == relu(max(even, odd))   (f32 on the VPU)
    a1 = jnp.maximum(jnp.maximum(y1[:, :H], y1[:, H:]), 0.0)     # (BT, L2*C1)

    # ---- Conv1d(C1->C2, k=3, p=1) + bias + ReLU ----------------------------
    y2 = jnp.dot(a1.astype(w2b_ref.dtype), w2b_ref[...],
                 preferred_element_type=jnp.float32) + b2_ref[...]
    a2 = jnp.maximum(y2, 0.0)                                    # (BT, L2*C2)

    # ---- Flatten (torch channel-major, folded into wfc) + Linear -----------
    out = jnp.dot(a2.astype(wfc_ref.dtype), wfc_ref[...],
                  preferred_element_type=jnp.float32) + bfc_ref[...]
    o_ref[...] = out.astype(o_ref.dtype)


# -----------------------------------------------------------------------------
# One-time (model init) weight preprocessing — hoisted out of the forward path.
# -----------------------------------------------------------------------------
def make_cnn_encoder_params(w1, b1, w2, b2, wfc, bfc, in_size,
                            compute_dtype=jnp.bfloat16):
    """Banded conv weights, flatten-permuted + lane-padded fc weight, bf16."""
    C1, _, K = w1.shape
    C2 = w2.shape[0]
    OUT = wfc.shape[0]
    L = in_size
    L2 = L // 2
    OUT_PAD = _round_up(OUT, 128)

    # conv1+pool banded weight: W1band[p, j*L2*C1 + i*C1 + c] = w1[c,0,k]
    # where p = 2*i + j + k - 1 (zero padding implicit via dropped rows).
    pp = np.arange(L)[:, None, None, None]
    jj = np.arange(2)[None, :, None, None]
    ii = np.arange(L2)[None, None, :, None]
    kk = np.arange(K)[None, None, None, :]
    S1 = (pp == 2 * ii + jj + kk - 1).astype(np.float32)         # (L,2,L2,K)
    w1t = jnp.transpose(w1[:, 0, :])                             # (K, C1)
    w1band = jnp.einsum('pjik,kc->pjic', S1, w1t).reshape(L, 2 * L2 * C1)
    b1r = jnp.tile(b1, 2 * L2)[None, :].astype(jnp.float32)

    # conv2 banded weight: W2band[i'*C1 + c, i*C2 + d] = w2[d,c,k], i' = i+k-1.
    ip = np.arange(L2)[:, None, None]
    i2 = np.arange(L2)[None, :, None]
    k2 = np.arange(K)[None, None, :]
    S2 = (ip == i2 + k2 - 1).astype(np.float32)                  # (L2, L2, K)
    w2perm = jnp.transpose(w2, (2, 1, 0))                        # (K, C1, C2)
    w2band = jnp.einsum('pik,kcd->pcid', S2, w2perm).reshape(L2 * C1, L2 * C2)
    b2r = jnp.tile(b2, L2)[None, :].astype(jnp.float32)

    # fc weight: activations are (pos-major, channel); torch flatten is
    # channel-major -> permute.  Pad OUT up to a multiple of 128 with zero
    # columns so the kernel's output store is lane-dense (unmasked vst).
    wfc_p = jnp.transpose(wfc.reshape(OUT, C2, L2), (2, 1, 0)).reshape(
        L2 * C2, OUT)
    wfc_p = jnp.pad(wfc_p, ((0, 0), (0, OUT_PAD - OUT)))
    bfc_p = jnp.pad(bfc, (0, OUT_PAD - OUT))[None, :].astype(jnp.float32)

    return dict(
        w1band=jnp.asarray(w1band, compute_dtype),
        b1=b1r,
        w2band=jnp.asarray(w2band, compute_dtype),
        b2=b2r,
        wfc=jnp.asarray(wfc_p, compute_dtype),
        bfc=bfc_p,
        out_size=OUT,
    )


# -----------------------------------------------------------------------------
# Forward pass.
# -----------------------------------------------------------------------------
def _const_spec(shape, single_buffer):
    """BlockSpec for grid-invariant operands (same block on every grid step)."""
    index_map = lambda t: (0,) * len(shape)
    if single_buffer:
        # Resident weights never change across steps -> no double buffering.
        return pl.BlockSpec(shape, index_map, pipeline_mode=pl.Buffered(1))
    return pl.BlockSpec(shape, index_map)


@functools.partial(jax.jit, static_argnames=("out_size", "single_buffer"))
def _cnn_encoder_impl(x, w1band, b1, w2band, b2, wfc, bfc, *, out_size,
                      single_buffer):
    B, L = x.shape
    H2 = w1band.shape[1]            # 2 * L2 * C1
    KC = w2band.shape[0]            # L2 * C1
    N2 = w2band.shape[1]            # L2 * C2
    FK = wfc.shape[0]               # L2 * C2
    OUT_PAD = wfc.shape[1]

    x = x.astype(w1band.dtype)      # bf16 operand bytes on the x DMA

    # Batch tiling: sublane-aligned rows, tiles up to 1024, and >=2 grid steps
    # whenever the padded batch allows (so v7x's second TensorCore gets work).
    Bp = _round_up(max(B, 8), 8)
    BT = min(1024, _round_up(pl.cdiv(Bp, 2), 8))
    BT = min(BT, Bp)
    nb = pl.cdiv(Bp, BT)
    Bp = nb * BT
    xp = jnp.pad(x, ((0, Bp - B), (0, 0))) if Bp != B else x

    out = pl.pallas_call(
        _cnn_encoder_kernel,
        out_shape=jax.ShapeDtypeStruct((Bp, OUT_PAD), jnp.float32),
        grid_spec=pltpu.PrefetchScalarGridSpec(
            num_scalar_prefetch=0,
            grid=(nb,),
            in_specs=[
                pl.BlockSpec((BT, L), lambda t: (t, 0)),
                _const_spec((L, H2), single_buffer),
                _const_spec((1, H2), single_buffer),
                _const_spec((KC, N2), single_buffer),
                _const_spec((1, N2), single_buffer),
                _const_spec((FK, OUT_PAD), single_buffer),
                _const_spec((1, OUT_PAD), single_buffer),
            ],
            out_specs=pl.BlockSpec((BT, OUT_PAD), lambda t: (t, 0)),
        ),
        compiler_params=pltpu.CompilerParams(
            dimension_semantics=("parallel",),
            vmem_limit_bytes=48 * 1024 * 1024,
        ),
    )(xp, w1band, b1, w2band, b2, wfc, bfc)
    return out[:B, :out_size]


def cnn_encoder_forward(x, params):
    """x: (B, in_size) f32 -> (B, out_size) f32, using preprocessed params."""
    args = (params["w1band"], params["b1"], params["w2band"], params["b2"],
            params["wfc"], params["bfc"])
    try:
        return _cnn_encoder_impl(x, *args, out_size=params["out_size"],
                                 single_buffer=True)
    except Exception:
        # pl.Buffered(1) unsupported on this jax build -> default buffering.
        return _cnn_encoder_impl(x, *args, out_size=params["out_size"],
                                 single_buffer=False)


# -----------------------------------------------------------------------------
# Plain-JAX reference of the PyTorch forward (NCL convs, torch flatten).
# -----------------------------------------------------------------------------
def reference_forward(x, w1, b1, w2, b2, wfc, bfc):
    B, L = x.shape
    C1 = w1.shape[0]
    xu = x[:, None, :]                                           # (B, 1, L)
    dn = ('NCH', 'OIH', 'NCH')
    y1 = lax.conv_general_dilated(xu, w1, (1,), ((1, 1),),
                                  dimension_numbers=dn) + b1[None, :, None]
    y1 = jnp.maximum(y1, 0.0)
    y1 = jnp.max(y1.reshape(B, C1, L // 2, 2), axis=-1)          # MaxPool1d(2,2)
    y2 = lax.conv_general_dilated(y1, w2, (1,), ((1, 1),),
                                  dimension_numbers=dn) + b2[None, :, None]
    y2 = jnp.maximum(y2, 0.0)
    flat = y2.reshape(B, -1)                                     # channel-major
    return flat @ wfc.T + bfc


if __name__ == "__main__":
    # Module config: in_size=16, out_size=32, use_batch_norm=False, batch=2.
    B, IN_SIZE, OUT_SIZE = 2, 16, 32
    C1, C2, K = 16, 32, 3
    FC_IN = C2 * (IN_SIZE // 2)                                  # 32 * 8 = 256

    key = jax.random.PRNGKey(0)
    ks = jax.random.split(key, 7)
    w1 = 0.2 * jax.random.normal(ks[0], (C1, 1, K), jnp.float32)
    b1 = 0.1 * jax.random.normal(ks[1], (C1,), jnp.float32)
    w2 = 0.1 * jax.random.normal(ks[2], (C2, C1, K), jnp.float32)
    b2 = 0.1 * jax.random.normal(ks[3], (C2,), jnp.float32)
    wfc = 0.05 * jax.random.normal(ks[4], (OUT_SIZE, FC_IN), jnp.float32)
    bfc = 0.1 * jax.random.normal(ks[5], (OUT_SIZE,), jnp.float32)
    x = jax.random.normal(ks[6], (B, IN_SIZE), jnp.float32)

    # One-time weight preprocessing (model init), then the Pallas forward.
    params = make_cnn_encoder_params(w1, b1, w2, b2, wfc, bfc, IN_SIZE)
    out = jax.block_until_ready(cnn_encoder_forward(x, params))

    ref = jax.block_until_ready(reference_forward(x, w1, b1, w2, b2, wfc, bfc))
    assert out.shape == (B, OUT_SIZE), out.shape
    # bf16 matmul operands with f32 accumulation -> loosened tolerance.
    np.testing.assert_allclose(np.asarray(out), np.asarray(ref),
                               rtol=2e-2, atol=2e-2)
    print("KERNEL_OK")
</pallas_src>

<mosaic_0001>
module attributes {stable_mosaic.version = 11 : i64} {
  func.func @_cnn_encoder_kernel(%arg0: i32, %arg1: memref<8x16xbf16, #tpu.memory_space<vmem>>, %arg2: memref<16x256xbf16, #tpu.memory_space<vmem>>, %arg3: memref<1x256xf32, #tpu.memory_space<vmem>>, %arg4: memref<128x256xbf16, #tpu.memory_space<vmem>>, %arg5: memref<1x256xf32, #tpu.memory_space<vmem>>, %arg6: memref<256x128xbf16, #tpu.memory_space<vmem>>, %arg7: memref<1x128xf32, #tpu.memory_space<vmem>>, %arg8: memref<8x128xf32, #tpu.memory_space<vmem>>) attributes {dimension_semantics = [#tpu.dimension_semantics<parallel>], iteration_bounds = array<i64: 1>, scalar_prefetch = 0 : i64, scratch_operands = 0 : i64, tpu.core_type = #tpu.core_type<tc>, window_params = [{transform_indices = @transform_0, window_bounds = array<i64: 8, 16>}, {pipeline_mode = #tpu.pipeline_mode<synchronous>, transform_indices = @transform_1, window_bounds = array<i64: 16, 256>}, {pipeline_mode = #tpu.pipeline_mode<synchronous>, transform_indices = @transform_2, window_bounds = array<i64: 1, 256>}, {pipeline_mode = #tpu.pipeline_mode<synchronous>, transform_indices = @transform_3, window_bounds = array<i64: 128, 256>}, {pipeline_mode = #tpu.pipeline_mode<synchronous>, transform_indices = @transform_4, window_bounds = array<i64: 1, 256>}, {pipeline_mode = #tpu.pipeline_mode<synchronous>, transform_indices = @transform_5, window_bounds = array<i64: 256, 128>}, {pipeline_mode = #tpu.pipeline_mode<synchronous>, transform_indices = @transform_6, window_bounds = array<i64: 1, 128>}, {transform_indices = @transform_7, window_bounds = array<i64: 8, 128>}]} {
    %c0 = arith.constant 0 : index
    %c0_0 = arith.constant 0 : index
    %0 = vector.load %arg1[%c0, %c0_0] : memref<8x16xbf16, #tpu.memory_space<vmem>>, vector<8x16xbf16>
    %c0_1 = arith.constant 0 : index
    %c0_2 = arith.constant 0 : index
    %1 = vector.load %arg2[%c0_1, %c0_2] : memref<16x256xbf16, #tpu.memory_space<vmem>>, vector<16x256xbf16>
    %cst = arith.constant dense<0.000000e+00> : vector<8x256xf32>
    %2 = tpu.matmul %0, %1, %cst {dimension_numbers = #tpu.dot_dimension_numbers<[1], [0], [0], [1], [0, 0, 1, 1], [], []>} : vector<8x16xbf16>, vector<16x256xbf16>, vector<8x256xf32> -> vector<8x256xf32>
    %c0_3 = arith.constant 0 : index
    %c0_4 = arith.constant 0 : index
    %3 = vector.load %arg3[%c0_3, %c0_4] : memref<1x256xf32, #tpu.memory_space<vmem>>, vector<1x256xf32>
    %4 = vector.broadcast %3 : vector<1x256xf32> to vector<8x256xf32>
    %5 = arith.addf %2, %4 : vector<8x256xf32>
    %6 = vector.extract_strided_slice %5 {offsets = [0, 0], sizes = [8, 128], strides = [1, 1]} : vector<8x256xf32> to vector<8x128xf32>
    %7 = vector.extract_strided_slice %5 {offsets = [0, 128], sizes = [8, 128], strides = [1, 1]} : vector<8x256xf32> to vector<8x128xf32>
    %8 = arith.maximumf %6, %7 : vector<8x128xf32>
    %cst_5 = arith.constant 0.000000e+00 : f32
    %9 = vector.broadcast %cst_5 : f32 to vector<8x128xf32>
    %10 = arith.maximumf %8, %9 : vector<8x128xf32>
    %11 = arith.truncf %10 : vector<8x128xf32> to vector<8x128xbf16>
    %c0_6 = arith.constant 0 : index
    %c0_7 = arith.constant 0 : index
    %12 = vector.load %arg4[%c0_6, %c0_7] : memref<128x256xbf16, #tpu.memory_space<vmem>>, vector<128x256xbf16>
    %cst_8 = arith.constant dense<0.000000e+00> : vector<8x256xf32>
    %13 = tpu.matmul %11, %12, %cst_8 {dimension_numbers = #tpu.dot_dimension_numbers<[1], [0], [0], [1], [0, 0, 1, 1], [], []>} : vector<8x128xbf16>, vector<128x256xbf16>, vector<8x256xf32> -> vector<8x256xf32>
    %c0_9 = arith.constant 0 : index
    %c0_10 = arith.constant 0 : index
    %14 = vector.load %arg5[%c0_9, %c0_10] : memref<1x256xf32, #tpu.memory_space<vmem>>, vector<1x256xf32>
    %15 = vector.broadcast %14 : vector<1x256xf32> to vector<8x256xf32>
    %16 = arith.addf %13, %15 : vector<8x256xf32>
    %cst_11 = arith.constant 0.000000e+00 : f32
    %17 = vector.broadcast %cst_11 : f32 to vector<8x256xf32>
    %18 = arith.maximumf %16, %17 : vector<8x256xf32>
    %19 = arith.truncf %18 : vector<8x256xf32> to vector<8x256xbf16>
    %c0_12 = arith.constant 0 : index
    %c0_13 = arith.constant 0 : index
    %20 = vector.load %arg6[%c0_12, %c0_13] : memref<256x128xbf16, #tpu.memory_space<vmem>>, vector<256x128xbf16>
    %cst_14 = arith.constant dense<0.000000e+00> : vector<8x128xf32>
    %21 = tpu.matmul %19, %20, %cst_14 {dimension_numbers = #tpu.dot_dimension_numbers<[1], [0], [0], [1], [0, 0, 1, 1], [], []>} : vector<8x256xbf16>, vector<256x128xbf16>, vector<8x128xf32> -> vector<8x128xf32>
    %c0_15 = arith.constant 0 : index
    %c0_16 = arith.constant 0 : index
    %22 = vector.load %arg7[%c0_15, %c0_16] : memref<1x128xf32, #tpu.memory_space<vmem>>, vector<1x128xf32>
    %23 = vector.broadcast %22 : vector<1x128xf32> to vector<8x128xf32>
    %24 = arith.addf %21, %23 : vector<8x128xf32>
    %c0_17 = arith.constant 0 : index
    %c0_18 = arith.constant 0 : index
    %25 = vector.load %arg8[%c0_17, %c0_18] : memref<8x128xf32, #tpu.memory_space<vmem>>, vector<8x128xf32>
    tpu.vector_store %arg8[%c0_17, %c0_18], %24 {strides = array<i32>} : memref<8x128xf32, #tpu.memory_space<vmem>>, vector<8x128xf32>,
    return
  }
  func.func @transform_0(%arg0: i32) -> (i32, i32) {
    %c0_i32 = arith.constant 0 : i32
    %c0_i32_0 = arith.constant 0 : i32
    return %arg0, %c0_i32 : i32, i32
  }
  func.func @transform_1(%arg0: i32) -> (i32, i32) {
    %c0_i32 = arith.constant 0 : i32
    %c0_i32_0 = arith.constant 0 : i32
    %c0_i32_1 = arith.constant 0 : i32
    return %c0_i32, %c0_i32_0 : i32, i32
  }
  func.func @transform_2(%arg0: i32) -> (i32, i32) {
    %c0_i32 = arith.constant 0 : i32
    %c0_i32_0 = arith.constant 0 : i32
    %c0_i32_1 = arith.constant 0 : i32
    return %c0_i32, %c0_i32_0 : i32, i32
  }
  func.func @transform_3(%arg0: i32) -> (i32, i32) {
    %c0_i32 = arith.constant 0 : i32
    %c0_i32_0 = arith.constant 0 : i32
    %c0_i32_1 = arith.constant 0 : i32
    return %c0_i32, %c0_i32_0 : i32, i32
  }
  func.func @transform_4(%arg0: i32) -> (i32, i32) {
    %c0_i32 = arith.constant 0 : i32
    %c0_i32_0 = arith.constant 0 : i32
    %c0_i32_1 = arith.constant 0 : i32
    return %c0_i32, %c0_i32_0 : i32, i32
  }
  func.func @transform_5(%arg0: i32) -> (i32, i32) {
    %c0_i32 = arith.constant 0 : i32
    %c0_i32_0 = arith.constant 0 : i32
    %c0_i32_1 = arith.constant 0 : i32
    return %c0_i32, %c0_i32_0 : i32, i32
  }
  func.func @transform_6(%arg0: i32) -> (i32, i32) {
    %c0_i32 = arith.constant 0 : i32
    %c0_i32_0 = arith.constant 0 : i32
    %c0_i32_1 = arith.constant 0 : i32
    return %c0_i32, %c0_i32_0 : i32, i32
  }
  func.func @transform_7(%arg0: i32) -> (i32, i32) {
    %c0_i32 = arith.constant 0 : i32
    %c0_i32_0 = arith.constant 0 : i32
    return %arg0, %c0_i32 : i32, i32
  }
}

module attributes {stable_mosaic.version = 11 : i64} {
  func.func @_cnn_encoder_kernel(%arg0: i32, %arg1: memref<8x16xbf16, #tpu.memory_space<vmem>>, %arg2: memref<16x256xbf16, #tpu.memory_space<vmem>>, %arg3: memref<1x256xf32, #tpu.memory_space<vmem>>, %arg4: memref<128x256xbf16, #tpu.memory_space<vmem>>, %arg5: memref<1x256xf32, #tpu.memory_space<vmem>>, %arg6: memref<256x128xbf16, #tpu.memory_space<vmem>>, %arg7: memref<1x128xf32, #tpu.memory_space<vmem>>, %arg8: memref<8x128xf32, #tpu.memory_space<vmem>>) attributes {dimension_semantics = [#tpu.dimension_semantics<parallel>], iteration_bounds = array<i64: 1>, scalar_prefetch = 0 : i64, scratch_operands = 0 : i64, tpu.core_type = #tpu.core_type<tc>, window_params = [{transform_indices = @transform_0, window_bounds = array<i64: 8, 16>}, {pipeline_mode = #tpu.pipeline_mode<synchronous>, transform_indices = @transform_1, window_bounds = array<i64: 16, 256>}, {pipeline_mode = #tpu.pipeline_mode<synchronous>, transform_indices = @transform_2, window_bounds = array<i64: 1, 256>}, {pipeline_mode = #tpu.pipeline_mode<synchronous>, transform_indices = @transform_3, window_bounds = array<i64: 128, 256>}, {pipeline_mode = #tpu.pipeline_mode<synchronous>, transform_indices = @transform_4, window_bounds = array<i64: 1, 256>}, {pipeline_mode = #tpu.pipeline_mode<synchronous>, transform_indices = @transform_5, window_bounds = array<i64: 256, 128>}, {pipeline_mode = #tpu.pipeline_mode<synchronous>, transform_indices = @transform_6, window_bounds = array<i64: 1, 128>}, {transform_indices = @transform_7, window_bounds = array<i64: 8, 128>}]} {
    %c0 = arith.constant 0 : index
    %c0_0 = arith.constant 0 : index
    %0 = vector.load %arg1[%c0, %c0_0] : memref<8x16xbf16, #tpu.memory_space<vmem>>, vector<8x16xbf16>
    %c0_1 = arith.constant 0 : index
    %c0_2 = arith.constant 0 : index
    %1 = vector.load %arg2[%c0_1, %c0_2] : memref<16x256xbf16, #tpu.memory_space<vmem>>, vector<16x256xbf16>
    %cst = arith.constant dense<0.000000e+00> : vector<8x256xf32>
    %2 = tpu.matmul %0, %1, %cst {dimension_numbers = #tpu.dot_dimension_numbers<[1], [0], [0], [1], [0, 0, 1, 1], [], []>} : vector<8x16xbf16>, vector<16x256xbf16>, vector<8x256xf32> -> vector<8x256xf32>
    %c0_3 = arith.constant 0 : index
    %c0_4 = arith.constant 0 : index
    %3 = vector.load %arg3[%c0_3, %c0_4] : memref<1x256xf32, #tpu.memory_space<vmem>>, vector<1x256xf32>
    %4 = vector.broadcast %3 : vector<1x256xf32> to vector<8x256xf32>
    %5 = arith.addf %2, %4 : vector<8x256xf32>
    %6 = vector.extract_strided_slice %5 {offsets = [0, 0], sizes = [8, 128], strides = [1, 1]} : vector<8x256xf32> to vector<8x128xf32>
    %7 = vector.extract_strided_slice %5 {offsets = [0, 128], sizes = [8, 128], strides = [1, 1]} : vector<8x256xf32> to vector<8x128xf32>
    %8 = arith.maximumf %6, %7 : vector<8x128xf32>
    %cst_5 = arith.constant 0.000000e+00 : f32
    %9 = vector.broadcast %cst_5 : f32 to vector<8x128xf32>
    %10 = arith.maximumf %8, %9 : vector<8x128xf32>
    %11 = arith.truncf %10 : vector<8x128xf32> to vector<8x128xbf16>
    %c0_6 = arith.constant 0 : index
    %c0_7 = arith.constant 0 : index
    %12 = vector.load %arg4[%c0_6, %c0_7] : memref<128x256xbf16, #tpu.memory_space<vmem>>, vector<128x256xbf16>
    %cst_8 = arith.constant dense<0.000000e+00> : vector<8x256xf32>
    %13 = tpu.matmul %11, %12, %cst_8 {dimension_numbers = #tpu.dot_dimension_numbers<[1], [0], [0], [1], [0, 0, 1, 1], [], []>} : vector<8x128xbf16>, vector<128x256xbf16>, vector<8x256xf32> -> vector<8x256xf32>
    %c0_9 = arith.constant 0 : index
    %c0_10 = arith.constant 0 : index
    %14 = vector.load %arg5[%c0_9, %c0_10] : memref<1x256xf32, #tpu.memory_space<vmem>>, vector<1x256xf32>
    %15 = vector.broadcast %14 : vector<1x256xf32> to vector<8x256xf32>
    %16 = arith.addf %13, %15 : vector<8x256xf32>
    %cst_11 = arith.constant 0.000000e+00 : f32
    %17 = vector.broadcast %cst_11 : f32 to vector<8x256xf32>
    %18 = arith.maximumf %16, %17 : vector<8x256xf32>
    %19 = arith.truncf %18 : vector<8x256xf32> to vector<8x256xbf16>
    %c0_12 = arith.constant 0 : index
    %c0_13 = arith.constant 0 : index
    %20 = vector.load %arg6[%c0_12, %c0_13] : memref<256x128xbf16, #tpu.memory_space<vmem>>, vector<256x128xbf16>
    %cst_14 = arith.constant dense<0.000000e+00> : vector<8x128xf32>
    %21 = tpu.matmul %19, %20, %cst_14 {dimension_numbers = #tpu.dot_dimension_numbers<[1], [0], [0], [1], [0, 0, 1, 1], [], []>} : vector<8x256xbf16>, vector<256x128xbf16>, vector<8x128xf32> -> vector<8x128xf32>
    %c0_15 = arith.constant 0 : index
    %c0_16 = arith.constant 0 : index
    %22 = vector.load %arg7[%c0_15, %c0_16] : memref<1x128xf32, #tpu.memory_space<vmem>>, vector<1x128xf32>
    %23 = vector.broadcast %22 : vector<1x128xf32> to vector<8x128xf32>
    %24 = arith.addf %21, %23 : vector<8x128xf32>
    %c0_17 = arith.constant 0 : index
    %c0_18 = arith.constant 0 : index
    %25 = vector.load %arg8[%c0_17, %c0_18] : memref<8x128xf32, #tpu.memory_space<vmem>>, vector<8x128xf32>
    tpu.vector_store %arg8[%c0_17, %c0_18], %24 {strides = array<i32>} : memref<8x128xf32, #tpu.memory_space<vmem>>, vector<8x128xf32>,
    return
  }
  func.func @transform_0(%arg0: i32) -> (i32, i32) {
    %c0_i32 = arith.constant 0 : i32
    %c0_i32_0 = arith.constant 0 : i32
    return %arg0, %c0_i32 : i32, i32
  }
  func.func @transform_1(%arg0: i32) -> (i32, i32) {
    %c0_i32 = arith.constant 0 : i32
    %c0_i32_0 = arith.constant 0 : i32
    %c0_i32_1 = arith.constant 0 : i32
    return %c0_i32, %c0_i32_0 : i32, i32
  }
  func.func @transform_2(%arg0: i32) -> (i32, i32) {
    %c0_i32 = arith.constant 0 : i32
    %c0_i32_0 = arith.constant 0 : i32
    %c0_i32_1 = arith.constant 0 : i32
    return %c0_i32, %c0_i32_0 : i32, i32
  }
  func.func @transform_3(%arg0: i32) -> (i32, i32) {
    %c0_i32 = arith.constant 0 : i32
    %c0_i32_0 = arith.constant 0 : i32
    %c0_i32_1 = arith.constant 0 : i32
    return %c0_i32, %c0_i32_0 : i32, i32
  }
  func.func @transform_4(%arg0: i32) -> (i32, i32) {
    %c0_i32 = arith.constant 0 : i32
    %c0_i32_0 = arith.constant 0 : i32
    %c0_i32_1 = arith.constant 0 : i32
    return %c0_i32, %c0_i32_0 : i32, i32
  }
  func.func @transform_5(%arg0: i32) -> (i32, i32) {
    %c0_i32 = arith.constant 0 : i32
    %c0_i32_0 = arith.constant 0 : i32
    %c0_i32_1 = arith.constant 0 : i32
    return %c0_i32, %c0_i32_0 : i32, i32
  }
  func.func @transform_6(%arg0: i32) -> (i32, i32) {
    %c0_i32 = arith.constant 0 : i32
    %c0_i32_0 = arith.constant 0 : i32
    %c0_i32_1 = arith.constant 0 : i32
    return %c0_i32, %c0_i32_0 : i32, i32
  }
  func.func @transform_7(%arg0: i32) -> (i32, i32) {
    %c0_i32 = arith.constant 0 : i32
    %c0_i32_0 = arith.constant 0 : i32
    return %arg0, %c0_i32 : i32, i32
  }
}

</mosaic_0001>

<bundles_post_ra>
// kernel: _cnn_encoder_impl.1
= control target key start
LH: loop header
LB: loop body
LE: loop exit
PB: predicated region body
PF: predicated region fallthrough
CT: control target
= control target key end

     0   :  { %12 = vsyncpa [#allocation3], 0  ;;  %s721_s0 = inlined_call_operand.vmem [shape: bf16[8,16], index: 0, kind: input, shape index: {}]   ;;  %s722_s1 = inlined_call_operand.hbm [shape: bf16[16,256], index: 1, kind: input, shape index: {}]   ;;  %s723_s2 = inlined_call_operand.vmem [shape: f32[1,256], index: 2, kind: input, shape index: {}]   ;;  %s724_s3 = inlined_call_operand.hbm [shape: bf16[128,256], index: 3, kind: input, shape index: {}]   ;;  %s725_s4 = inlined_call_operand.vmem [shape: f32[1,256], index: 4, kind: input, shape index: {}]   ;;  %s726_s5 = inlined_call_operand.hbm [shape: bf16[256,128], index: 5, kind: input, shape index: {}]   ;;  %s727_s6 = inlined_call_operand.vmem [shape: f32[1,128], index: 6, kind: input, shape index: {}]   ;;  %s728_s7 = inlined_call_operand.vmem [shape: f32[8,128], index: 7, kind: output, shape index: {}]  }
   0x1   :  { %13 = vsyncpa [#allocation5], 0  ;;  %s649_s24 = smov [#allocation4]   ;;  %s650_s26 = smov [#allocation2]  }
   0x2   :  { %s35_s25 = sshll.u32 %s649_s24, 4  ;;  %s21_s27 = sshll.u32 %s650_s26, 4  ;;  %s36_s25 = int_to_ptr.vmem [resolvable:$true] %s35_s25  ;;  %s22_s27 = int_to_ptr.vmem [resolvable:$true] %s21_s27 }
   0x3   :  { %s593_s28 = scalar_lea.vmem %s36_s25, 2048  ;;  %p598_p1 = scmp.lt.s32.totalorder %s36_s25, %s36_s25 }
   0x4   :  { %p594_p0 = scmp.ne.s32.totalorder %s36_s25, %s593_s28  ;;  %p599_p2 = scmp.lt.s32.totalorder %s593_s28, %s593_s28 }
   0x6   :  { %p600_p3 = por %p599_p2, %p598_p1 }
   0x8   :  { %p601_p4 = pnand %p600_p3, %p594_p0 }
   0xa   :  { %604 = shalt.err (!%p601_p4)
}
   0xb   :  { %s651_s29 = smov 128   ;;  %s652_s30 = smov 8  }
   0xc   :  { %41 = dma.hbm_to_vmem [thread:$0]  %s724_s3, 2048, %s36_s25, [#allocation5], %s651_s29, %s651_s29, %s652_s30  }
   0xd   :  { %s613_s10 = scalar_lea.vmem %s22_s27, 256  ;;  %p618_p6 = scmp.lt.s32.totalorder %s22_s27, %s22_s27 }
   0xe   :  { %p614_p5 = scmp.ne.s32.totalorder %s22_s27, %s613_s10  ;;  %p619_p7 = scmp.lt.s32.totalorder %s613_s10, %s613_s10 }
  0x10   :  { %p620_p8 = por %p619_p7, %p618_p6 }
  0x12   :  { %p621_p9 = pnand %p620_p8, %p614_p5 }
  0x14   :  { %624 = shalt.err (!%p621_p9)
}
  0x15   :  { %27 = dma.hbm_to_vmem [thread:$0]  %s722_s1, 256, %s22_s27, [#allocation3], %s651_s29, %s651_s29, %s652_s30  }
  0x16   :  { %s653_s13 = smov [#allocation6]  }
  0x17   :  { %s49_s14 = sshll.u32 %s653_s13, 4  ;;  %s50_s14 = int_to_ptr.vmem [resolvable:$true] %s49_s14 }
  0x18   :  { %s633_s15 = scalar_lea.vmem %s50_s14, 2048  ;;  %p638_p11 = scmp.lt.s32.totalorder %s50_s14, %s50_s14 }
  0x19   :  { %p634_p10 = scmp.ne.s32.totalorder %s50_s14, %s633_s15  ;;  %p639_p12 = scmp.lt.s32.totalorder %s633_s15, %s633_s15 }
  0x1b   :  { %p640_p13 = por %p639_p12, %p638_p11 }
  0x1d   :  { %p641_p0 = pnand %p640_p13, %p634_p10 }
  0x1f   :  { %644 = shalt.err (!%p641_p0)
}
  0x20   :  { %s654_s3 = smov 64   ;;  %s655_s16 = smov 4  }
  0x21   :  { %55 = dma.hbm_to_vmem [thread:$0]  %s726_s5, 2048, %s50_s14, [#allocation5], %s654_s3, %s654_s3, %s655_s16  }
  0x22   :  { %645 = dma.done.wait [#allocation3], 256  }
  0x23   :  { %646 = vsyncadd [#allocation3], 4294967040 }
  0x24   :  { %647 = dma.done.wait [#allocation5], 4096  }
  0x25   :  { %648 = vsyncadd [#allocation5], 4294963200  ;;  %v656_v0 = vmov 0   ;;  %v542_v1 = vld [vmem:[#allocation2 + $0x4] ss:$8 sps:$4 sm:$0xff]   ;;  %vm93_vm0 = vcmask 130048   ;;  %v73_v32 = vlaneseq }
  0x26   :  { %129 = vmatprep.mubr.bf16.mxu0 %v656_v0  ;;  %281 = vmatprep.mubr.bf16.mxu1 %v656_v0  ;;  %v544_v2 = vld [vmem:[#allocation2] ss:$8 sps:$4 sm:$0xff]   ;;  %v545_v4 = vld [vmem:[#allocation4 + $0x74] ss:$8 sps:$4 sm:$0xff]   ;;  %v548_v6 = vld [vmem:[#allocation4 + $0x64] ss:$8 sps:$4 sm:$0xff]  }
  0x27   :  { %v68_v3 = vld [vmem:[%s721_s0] sm:$0xf]  ;;  %111 = vmatprep.subr.bf16.mxu0 %v542_v1  ;;  %249 = vmatprep.subr.bf16.mxu1 %v545_v4  ;;  %v550_v7 = vld [vmem:[#allocation4 + $0x60] ss:$8 sps:$4 sm:$0xff]   ;;  %v551_v8 = vld [vmem:[#allocation4 + $0x54] ss:$8 sps:$4 sm:$0xff]  }
  0x28   :  { %v547_v5 = vld [vmem:[#allocation4 + $0x70] ss:$8 sps:$4 sm:$0xff]   ;;  %112 = vmatpush1.bf16.msra.mxu0 %v544_v2  ;;  %v554_v10 = vld [vmem:[#allocation4 + $0x44] ss:$8 sps:$4 sm:$0xff]   ;;  %v556_v11 = vld [vmem:[#allocation4 + $0x40] ss:$8 sps:$4 sm:$0xff]  }
  0x29   :  { %250 = vmatpush1.bf16.msra.mxu1 %v547_v5  ;;  %v553_v9 = vld [vmem:[#allocation4 + $0x50] ss:$8 sps:$4 sm:$0xff]   ;;  %v557_v12 = vld [vmem:[#allocation4 + $0x34] ss:$8 sps:$4 sm:$0xff]   ;;  %v560_v14 = vld [vmem:[#allocation4 + $0x24] ss:$8 sps:$4 sm:$0xff]  }
  0x2a   :  { %251 = vmatprep.subr.bf16.mxu1 %v548_v6  ;;  %v559_v13 = vld [vmem:[#allocation4 + $0x30] ss:$8 sps:$4 sm:$0xff]   ;;  %v562_v15 = vld [vmem:[#allocation4 + $0x20] ss:$8 sps:$4 sm:$0xff]   ;;  %v563_v16 = vld [vmem:[#allocation4 + $0x14] ss:$8 sps:$4 sm:$0xff]  }
  0x2b   :  { %478 = vmatmul.mubr.msk.bf16.vlgmr.msra.gmra.mxu0 %vm93_vm0, %v68_v3  ;;  %v565_v17 = vld [vmem:[#allocation4 + $0x10] ss:$8 sps:$4 sm:$0xff]   ;;  %v566_v18 = vld [vmem:[#allocation4 + $0x4] ss:$8 sps:$4 sm:$0xff]   ;;  %v568_v19 = vld [vmem:[#allocation4] ss:$8 sps:$4 sm:$0xff]  }
  0x2c   :  { %v569_v20 = vld [vmem:[#allocation6 + $0x78] sm:$0xff]   ;;  %v571_v22 = vld [vmem:[#allocation6 + $0x70] sm:$0xff]   ;;  %v573_v24 = vld [vmem:[#allocation6 + $0x68] sm:$0xff]   ;;  %v74_v33 = vshrl.u32 %v73_v32, 7 }
  0x2d   :  { %252 = vmatpush1.bf16.msra.mxu1 %v550_v7  ;;  %v570_v21 = vld [vmem:[#allocation6 + $0x38] sm:$0xff]   ;;  %512 = vmatprep.subr.bf16.mxu0 %v569_v20  ;;  %v572_v23 = vld [vmem:[#allocation6 + $0x30] sm:$0xff]   ;;  %v574_v25 = vld [vmem:[#allocation6 + $0x28] sm:$0xff]  }
  0x2e   :  { %253 = vmatprep.subr.bf16.mxu1 %v551_v8  ;;  %513 = vmatpush3.bf16.msra.mxu0 %v570_v21  ;;  %v575_v26 = vld [vmem:[#allocation6 + $0x60] sm:$0xff]   ;;  %v577_v28 = vld [vmem:[#allocation6 + $0x58] sm:$0xff]   ;;  %v579_v30 = vld [vmem:[#allocation6 + $0x50] sm:$0xff]   ;;  %v75_v34 = vsub.s32 0, %v74_v33  ;;  %v79_v35 = vsub.s32 1, %v74_v33 }
  0x2f   :  { %514 = vmatprep.subr.bf16.mxu0 %v571_v22  ;;  %v576_v27 = vld [vmem:[#allocation6 + $0x20] sm:$0xff]   ;;  %v578_v29 = vld [vmem:[#allocation6 + $0x18] sm:$0xff]   ;;  %v580_v31 = vld [vmem:[#allocation6 + $0x10] sm:$0xff]  }
  0x30   :  { %v71_v36 = vld [vmem:[%s723_s2] sm:$0x3]  ;;  %v581_v48 = vld [vmem:[#allocation6 + $0x48] sm:$0xff]   ;;  %v583_v50 = vld [vmem:[#allocation6 + $0x40] sm:$0xff]  }
  0x31   :  { %254 = vmatpush1.bf16.msra.mxu1 %v553_v9  ;;  %v76_v37 = vrot.slane %v71_v36, %v75_v34  ;;  %v80_v38 = vrot.slane %v71_v36, %v79_v35  ;;  %v582_v49 = vld [vmem:[#allocation6 + $0x8] sm:$0xff]   ;;  %v584_v51 = vld [vmem:[#allocation6] sm:$0xff]   ;;  %v157_v52 = vld [vmem:[%s725_s4] sm:$0x3] }
  0x32   :  { %255 = vmatprep.subr.bf16.mxu1 %v554_v10  ;;  %515 = vmatpush3.bf16.msra.mxu0 %v572_v23  ;;  %v162_v53 = vrot.slane %v157_v52, %v75_v34  ;;  %v166_v54 = vrot.slane %v157_v52, %v79_v35  ;;  %v495_v2 = vld [vmem:[%s727_s6] ss:$0 sm:$0xff] }
  0x33   :  { %516 = vmatprep.subr.bf16.mxu0 %v573_v24 }
  0x35   :  { %256 = vmatpush1.bf16.msra.mxu1 %v556_v11 }
  0x36   :  { %257 = vmatprep.subr.bf16.mxu1 %v557_v12  ;;  %517 = vmatpush3.bf16.msra.mxu0 %v574_v25 }
  0x37   :  { %518 = vmatprep.subr.bf16.mxu0 %v575_v26 }
  0x39   :  { %258 = vmatpush1.bf16.msra.mxu1 %v559_v13 }
  0x3a   :  { %259 = vmatprep.subr.bf16.mxu1 %v560_v14  ;;  %519 = vmatpush3.bf16.msra.mxu0 %v576_v27 }
  0x3b   :  { %520 = vmatprep.subr.bf16.mxu0 %v577_v28 }
  0x3d   :  { %260 = vmatpush1.bf16.msra.mxu1 %v562_v15 }
  0x3e   :  { %261 = vmatprep.subr.bf16.mxu1 %v563_v16  ;;  %521 = vmatpush3.bf16.msra.mxu0 %v578_v29 }
  0x3f   :  { %522 = vmatprep.subr.bf16.mxu0 %v579_v30 }
  0x41   :  { %262 = vmatpush1.bf16.msra.mxu1 %v565_v17 }
  0x42   :  { %263 = vmatprep.subr.bf16.mxu1 %v566_v18  ;;  %523 = vmatpush3.bf16.msra.mxu0 %v580_v31 }
  0x43   :  { %524 = vmatprep.subr.bf16.mxu0 %v581_v48 }
  0x45   :  { %264 = vmatpush1.bf16.msra.mxu1 %v568_v19 }
  0x46   :  { %525 = vmatpush3.bf16.msra.mxu0 %v582_v49 }
  0x47   :  { %526 = vmatprep.subr.bf16.mxu0 %v583_v50 }
  0x4a   :  { %527 = vmatpush3.bf16.msra.mxu0 %v584_v51 }
  0xeb   :  { %v131_v39 = vpop.f32.mrf.mxu0 }
  0xec   :  { %v132_v41 = vadd.f32 %v131_v39, %v76_v37 }
  0xed   :  { %v133_v40 = vpop.f32.mrf.mxu0 }
  0xee   :  { %v134_v42 = vadd.f32 %v133_v40, %v80_v38 }
  0xef   :  { %v135_v43 = vpop.f32.mrf.mxu0 }
  0xf0   :  { %v138_v44 = vmax.f32 %v132_v41, %v134_v42 }
  0xf1   :  { %v136_v45 = vpop.f32.mrf.mxu0 }
  0xf2   :  { %v139_v46 = vmax.f32 %v138_v44, 0.0 }
  0xf4   :  { %v140_v47 = vpack.c.bf16 %v139_v46, %v139_v46 }
  0xf6   :  { %282 = vmatmul.mubr.bf16.vlgmr.msra.gmra.mxu1 %v140_v47 }
 0x1b6   :  { %v283_v55 = vpop.f32.mrf.mxu1 }
 0x1b7   :  { %v284_v56 = vadd.f32 %v283_v55, %v162_v53 }
 0x1b8   :  { %v285_v57 = vpop.f32.mrf.mxu1 }
 0x1b9   :  { %v286_v58 = vadd.f32 %v285_v57, %v166_v54  ;;  %v290_v59 = vmax.f32 %v284_v56, 0.0 }
 0x1ba   :  { %v287_v60 = vpop.f32.mrf.mxu1 }
 0x1bb   :  { %v291_v61 = vmax.f32 %v286_v58, 0.0  ;;  %v292_v0 = vpack.c.bf16 %v290_v59, %v290_v59 }
 0x1bc   :  { %v288_v62 = vpop.f32.mrf.mxu1 }
 0x1bd   :  { %v293_v63 = vpack.c.bf16 %v291_v61, %v291_v61 }
 0x1bf   :  { %461 = vmatprep.mubr.bf16.mxu0 %v293_v63 }
 0x1c0   :  { %462 = vmatmul.mubr.bf16.vlgmr.msra.gmra.mxu0 %v292_v0 }
 0x280   :  { %v528_v1 = vpop.f32.mrf.mxu0 }
 0x282   :  { %v529_v3 = vpop.f32.mrf.mxu0 }
 0x283   :  { %v530_v4 = vadd.f32 %v529_v3, %v528_v1 }
 0x284   :  { %v531_v5 = vpop.f32.mrf.mxu0 }
 0x285   :  { %v464_v6 = vadd.f32 %v530_v4, %v495_v2 }
 0x286   :  { %v532_v7 = vpop.f32.mrf.mxu0 }
 0x287   :  { %469 = vst [vmem:[%s728_s7] sm:$0xff] %v464_v6 }
 0x288   :  { %474 = vsyncpa [#allocation3], 1 }
 0x289   :  { %475 = vsyncpa [#allocation5], 1 }

// kernel: _cnn_encoder_impl.1
= control target key start
LH: loop header
LB: loop body
LE: loop exit
PB: predicated region body
PF: predicated region fallthrough
CT: control target
= control target key end

     0   :  { %12 = vsyncpa [#allocation3], 0  ;;  %s721_s0 = inlined_call_operand.vmem [shape: bf16[8,16], index: 0, kind: input, shape index: {}]   ;;  %s722_s1 = inlined_call_operand.hbm [shape: bf16[16,256], index: 1, kind: input, shape index: {}]   ;;  %s723_s2 = inlined_call_operand.vmem [shape: f32[1,256], index: 2, kind: input, shape index: {}]   ;;  %s724_s3 = inlined_call_operand.hbm [shape: bf16[128,256], index: 3, kind: input, shape index: {}]   ;;  %s725_s4 = inlined_call_operand.vmem [shape: f32[1,256], index: 4, kind: input, shape index: {}]   ;;  %s726_s5 = inlined_call_operand.hbm [shape: bf16[256,128], index: 5, kind: input, shape index: {}]   ;;  %s727_s6 = inlined_call_operand.vmem [shape: f32[1,128], index: 6, kind: input, shape index: {}]   ;;  %s728_s7 = inlined_call_operand.vmem [shape: f32[8,128], index: 7, kind: output, shape index: {}]  }
   0x1   :  { %13 = vsyncpa [#allocation5], 0  ;;  %s649_s24 = smov [#allocation4]   ;;  %s650_s26 = smov [#allocation2]  }
   0x2   :  { %s35_s25 = sshll.u32 %s649_s24, 4  ;;  %s21_s27 = sshll.u32 %s650_s26, 4  ;;  %s36_s25 = int_to_ptr.vmem [resolvable:$true] %s35_s25  ;;  %s22_s27 = int_to_ptr.vmem [resolvable:$true] %s21_s27 }
   0x3   :  { %s593_s28 = scalar_lea.vmem %s36_s25, 2048  ;;  %p598_p1 = scmp.lt.s32.totalorder %s36_s25, %s36_s25 }
   0x4   :  { %p594_p0 = scmp.ne.s32.totalorder %s36_s25, %s593_s28  ;;  %p599_p2 = scmp.lt.s32.totalorder %s593_s28, %s593_s28 }
   0x6   :  { %p600_p3 = por %p599_p2, %p598_p1 }
   0x8   :  { %p601_p4 = pnand %p600_p3, %p594_p0 }
   0xa   :  { %604 = shalt.err (!%p601_p4)
}
   0xb   :  { %s651_s29 = smov 128   ;;  %s652_s30 = smov 8  }
   0xc   :  { %41 = dma.hbm_to_vmem [thread:$0]  %s724_s3, 2048, %s36_s25, [#allocation5], %s651_s29, %s651_s29, %s652_s30  }
   0xd   :  { %s613_s10 = scalar_lea.vmem %s22_s27, 256  ;;  %p618_p6 = scmp.lt.s32.totalorder %s22_s27, %s22_s27 }
   0xe   :  { %p614_p5 = scmp.ne.s32.totalorder %s22_s27, %s613_s10  ;;  %p619_p7 = scmp.lt.s32.totalorder %s613_s10, %s613_s10 }
  0x10   :  { %p620_p8 = por %p619_p7, %p618_p6 }
  0x12   :  { %p621_p9 = pnand %p620_p8, %p614_p5 }
  0x14   :  { %624 = shalt.err (!%p621_p9)
}
  0x15   :  { %27 = dma.hbm_to_vmem [thread:$0]  %s722_s1, 256, %s22_s27, [#allocation3], %s651_s29, %s651_s29, %s652_s30  }
  0x16   :  { %s653_s13 = smov [#allocation6]  }
  0x17   :  { %s49_s14 = sshll.u32 %s653_s13, 4  ;;  %s50_s14 = int_to_ptr.vmem [resolvable:$true] %s49_s14 }
  0x18   :  { %s633_s15 = scalar_lea.vmem %s50_s14, 2048  ;;  %p638_p11 = scmp.lt.s32.totalorder %s50_s14, %s50_s14 }
  0x19   :  { %p634_p10 = scmp.ne.s32.totalorder %s50_s14, %s633_s15  ;;  %p639_p12 = scmp.lt.s32.totalorder %s633_s15, %s633_s15 }
  0x1b   :  { %p640_p13 = por %p639_p12, %p638_p11 }
  0x1d   :  { %p641_p0 = pnand %p640_p13, %p634_p10 }
  0x1f   :  { %644 = shalt.err (!%p641_p0)
}
  0x20   :  { %s654_s3 = smov 64   ;;  %s655_s16 = smov 4  }
  0x21   :  { %55 = dma.hbm_to_vmem [thread:$0]  %s726_s5, 2048, %s50_s14, [#allocation5], %s654_s3, %s654_s3, %s655_s16  }
  0x22   :  { %645 = dma.done.wait [#allocation3], 256  }
  0x23   :  { %646 = vsyncadd [#allocation3], 4294967040 }
  0x24   :  { %647 = dma.done.wait [#allocation5], 4096  }
  0x25   :  { %648 = vsyncadd [#allocation5], 4294963200  ;;  %v656_v0 = vmov 0   ;;  %v542_v1 = vld [vmem:[#allocation2 + $0x4] ss:$8 sps:$4 sm:$0xff]   ;;  %vm93_vm0 = vcmask 130048   ;;  %v73_v32 = vlaneseq }
  0x26   :  { %129 = vmatprep.mubr.bf16.mxu0 %v656_v0  ;;  %281 = vmatprep.mubr.bf16.mxu1 %v656_v0  ;;  %v544_v2 = vld [vmem:[#allocation2] ss:$8 sps:$4 sm:$0xff]   ;;  %v545_v4 = vld [vmem:[#allocation4 + $0x74] ss:$8 sps:$4 sm:$0xff]   ;;  %v548_v6 = vld [vmem:[#allocation4 + $0x64] ss:$8 sps:$4 sm:$0xff]  }
  0x27   :  { %v68_v3 = vld [vmem:[%s721_s0] sm:$0xf]  ;;  %111 = vmatprep.subr.bf16.mxu0 %v542_v1  ;;  %249 = vmatprep.subr.bf16.mxu1 %v545_v4  ;;  %v550_v7 = vld [vmem:[#allocation4 + $0x60] ss:$8 sps:$4 sm:$0xff]   ;;  %v551_v8 = vld [vmem:[#allocation4 + $0x54] ss:$8 sps:$4 sm:$0xff]  }
  0x28   :  { %v547_v5 = vld [vmem:[#allocation4 + $0x70] ss:$8 sps:$4 sm:$0xff]   ;;  %112 = vmatpush1.bf16.msra.mxu0 %v544_v2  ;;  %v554_v10 = vld [vmem:[#allocation4 + $0x44] ss:$8 sps:$4 sm:$0xff]   ;;  %v556_v11 = vld [vmem:[#allocation4 + $0x40] ss:$8 sps:$4 sm:$0xff]  }
  0x29   :  { %250 = vmatpush1.bf16.msra.mxu1 %v547_v5  ;;  %v553_v9 = vld [vmem:[#allocation4 + $0x50] ss:$8 sps:$4 sm:$0xff]   ;;  %v557_v12 = vld [vmem:[#allocation4 + $0x34] ss:$8 sps:$4 sm:$0xff]   ;;  %v560_v14 = vld [vmem:[#allocation4 + $0x24] ss:$8 sps:$4 sm:$0xff]  }
  0x2a   :  { %251 = vmatprep.subr.bf16.mxu1 %v548_v6  ;;  %v559_v13 = vld [vmem:[#allocation4 + $0x30] ss:$8 sps:$4 sm:$0xff]   ;;  %v562_v15 = vld [vmem:[#allocation4 + $0x20] ss:$8 sps:$4 sm:$0xff]   ;;  %v563_v16 = vld [vmem:[#allocation4 + $0x14] ss:$8 sps:$4 sm:$0xff]  }
  0x2b   :  { %478 = vmatmul.mubr.msk.bf16.vlgmr.msra.gmra.mxu0 %vm93_vm0, %v68_v3  ;;  %v565_v17 = vld [vmem:[#allocation4 + $0x10] ss:$8 sps:$4 sm:$0xff]   ;;  %v566_v18 = vld [vmem:[#allocation4 + $0x4] ss:$8 sps:$4 sm:$0xff]   ;;  %v568_v19 = vld [vmem:[#allocation4] ss:$8 sps:$4 sm:$0xff]  }
  0x2c   :  { %v569_v20 = vld [vmem:[#allocation6 + $0x78] sm:$0xff]   ;;  %v571_v22 = vld [vmem:[#allocation6 + $0x70] sm:$0xff]   ;;  %v573_v24 = vld [vmem:[#allocation6 + $0x68] sm:$0xff]   ;;  %v74_v33 = vshrl.u32 %v73_v32, 7 }
  0x2d   :  { %252 = vmatpush1.bf16.msra.mxu1 %v550_v7  ;;  %v570_v21 = vld [vmem:[#allocation6 + $0x38] sm:$0xff]   ;;  %512 = vmatprep.subr.bf16.mxu0 %v569_v20  ;;  %v572_v23 = vld [vmem:[#allocation6 + $0x30] sm:$0xff]   ;;  %v574_v25 = vld [vmem:[#allocation6 + $0x28] sm:$0xff]  }
  0x2e   :  { %253 = vmatprep.subr.bf16.mxu1 %v551_v8  ;;  %513 = vmatpush3.bf16.msra.mxu0 %v570_v21  ;;  %v575_v26 = vld [vmem:[#allocation6 + $0x60] sm:$0xff]   ;;  %v577_v28 = vld [vmem:[#allocation6 + $0x58] sm:$0xff]   ;;  %v579_v30 = vld [vmem:[#allocation6 + $0x50] sm:$0xff]   ;;  %v75_v34 = vsub.s32 0, %v74_v33  ;;  %v79_v35 = vsub.s32 1, %v74_v33 }
  0x2f   :  { %514 = vmatprep.subr.bf16.mxu0 %v571_v22  ;;  %v576_v27 = vld [vmem:[#allocation6 + $0x20] sm:$0xff]   ;;  %v578_v29 = vld [vmem:[#allocation6 + $0x18] sm:$0xff]   ;;  %v580_v31 = vld [vmem:[#allocation6 + $0x10] sm:$0xff]  }
  0x30   :  { %v71_v36 = vld [vmem:[%s723_s2] sm:$0x3]  ;;  %v581_v48 = vld [vmem:[#allocation6 + $0x48] sm:$0xff]   ;;  %v583_v50 = vld [vmem:[#allocation6 + $0x40] sm:$0xff]  }
  0x31   :  { %254 = vmatpush1.bf16.msra.mxu1 %v553_v9  ;;  %v76_v37 = vrot.slane %v71_v36, %v75_v34  ;;  %v80_v38 = vrot.slane %v71_v36, %v79_v35  ;;  %v582_v49 = vld [vmem:[#allocation6 + $0x8] sm:$0xff]   ;;  %v584_v51 = vld [vmem:[#allocation6] sm:$0xff]   ;;  %v157_v52 = vld [vmem:[%s725_s4] sm:$0x3] }
  0x32   :  { %255 = vmatprep.subr.bf16.mxu1 %v554_v10  ;;  %515 = vmatpush3.bf16.msra.mxu0 %v572_v23  ;;  %v162_v53 = vrot.slane %v157_v52, %v75_v34  ;;  %v166_v54 = vrot.slane %v157_v52, %v79_v35  ;;  %v495_v2 = vld [vmem:[%s727_s6] ss:$0 sm:$0xff] }
  0x33   :  { %516 = vmatprep.subr.bf16.mxu0 %v573_v24 }
  0x35   :  { %256 = vmatpush1.bf16.msra.mxu1 %v556_v11 }
  0x36   :  { %257 = vmatprep.subr.bf16.mxu1 %v557_v12  ;;  %517 = vmatpush3.bf16.msra.mxu0 %v574_v25 }
  0x37   :  { %518 = vmatprep.subr.bf16.mxu0 %v575_v26 }
  0x39   :  { %258 = vmatpush1.bf16.msra.mxu1 %v559_v13 }
  0x3a   :  { %259 = vmatprep.subr.bf16.mxu1 %v560_v14  ;;  %519 = vmatpush3.bf16.msra.mxu0 %v576_v27 }
  0x3b   :  { %520 = vmatprep.subr.bf16.mxu0 %v577_v28 }
  0x3d   :  { %260 = vmatpush1.bf16.msra.mxu1 %v562_v15 }
  0x3e   :  { %261 = vmatprep.subr.bf16.mxu1 %v563_v16  ;;  %521 = vmatpush3.bf16.msra.mxu0 %v578_v29 }
  0x3f   :  { %522 = vmatprep.subr.bf16.mxu0 %v579_v30 }
  0x41   :  { %262 = vmatpush1.bf16.msra.mxu1 %v565_v17 }
  0x42   :  { %263 = vmatprep.subr.bf16.mxu1 %v566_v18  ;;  %523 = vmatpush3.bf16.msra.mxu0 %v580_v31 }
  0x43   :  { %524 = vmatprep.subr.bf16.mxu0 %v581_v48 }
  0x45   :  { %264 = vmatpush1.bf16.msra.mxu1 %v568_v19 }
  0x46   :  { %525 = vmatpush3.bf16.msra.mxu0 %v582_v49 }
  0x47   :  { %526 = vmatprep.subr.bf16.mxu0 %v583_v50 }
  0x4a   :  { %527 = vmatpush3.bf16.msra.mxu0 %v584_v51 }
  0xeb   :  { %v131_v39 = vpop.f32.mrf.mxu0 }
  0xec   :  { %v132_v41 = vadd.f32 %v131_v39, %v76_v37 }
  0xed   :  { %v133_v40 = vpop.f32.mrf.mxu0 }
  0xee   :  { %v134_v42 = vadd.f32 %v133_v40, %v80_v38 }
  0xef   :  { %v135_v43 = vpop.f32.mrf.mxu0 }
  0xf0   :  { %v138_v44 = vmax.f32 %v132_v41, %v134_v42 }
  0xf1   :  { %v136_v45 = vpop.f32.mrf.mxu0 }
  0xf2   :  { %v139_v46 = vmax.f32 %v138_v44, 0.0 }
  0xf4   :  { %v140_v47 = vpack.c.bf16 %v139_v46, %v139_v46 }
  0xf6   :  { %282 = vmatmul.mubr.bf16.vlgmr.msra.gmra.mxu1 %v140_v47 }
 0x1b6   :  { %v283_v55 = vpop.f32.mrf.mxu1 }
 0x1b7   :  { %v284_v56 = vadd.f32 %v283_v55, %v162_v53 }
 0x1b8   :  { %v285_v57 = vpop.f32.mrf.mxu1 }
 0x1b9   :  { %v286_v58 = vadd.f32 %v285_v57, %v166_v54  ;;  %v290_v59 = vmax.f32 %v284_v56, 0.0 }
 0x1ba   :  { %v287_v60 = vpop.f32.mrf.mxu1 }
 0x1bb   :  { %v291_v61 = vmax.f32 %v286_v58, 0.0  ;;  %v292_v0 = vpack.c.bf16 %v290_v59, %v290_v59 }
 0x1bc   :  { %v288_v62 = vpop.f32.mrf.mxu1 }
 0x1bd   :  { %v293_v63 = vpack.c.bf16 %v291_v61, %v291_v61 }
 0x1bf   :  { %461 = vmatprep.mubr.bf16.mxu0 %v293_v63 }
 0x1c0   :  { %462 = vmatmul.mubr.bf16.vlgmr.msra.gmra.mxu0 %v292_v0 }
 0x280   :  { %v528_v1 = vpop.f32.mrf.mxu0 }
 0x282   :  { %v529_v3 = vpop.f32.mrf.mxu0 }
 0x283   :  { %v530_v4 = vadd.f32 %v529_v3, %v528_v1 }
 0x284   :  { %v531_v5 = vpop.f32.mrf.mxu0 }
 0x285   :  { %v464_v6 = vadd.f32 %v530_v4, %v495_v2 }
 0x286   :  { %v532_v7 = vpop.f32.mrf.mxu0 }
 0x287   :  { %469 = vst [vmem:[%s728_s7] sm:$0xff] %v464_v6 }
 0x288   :  { %474 = vsyncpa [#allocation3], 1 }
 0x289   :  { %475 = vsyncpa [#allocation5], 1 }

</bundles_post_ra>
